<compile_context>
chip_gen: v7x
topology: tpu7x:2x2x1
jax: 0.10.0
libtpu: 0.0.40
codegen_flags: <defaults>
</compile_context>

<pallas_src>
import jax
import jax.numpy as jnp
from jax.experimental import pallas as pl
from jax.experimental.pallas import tpu as pltpu


_FSUB = 16    # feature-dim padding granule (covers f32 8-sublane and bf16 16-sublane)
_LANE = 128   # lane granule for the batch axis


def _round_up(x, m):
    return ((x + m - 1) // m) * m


def _mlp_actor_kernel(al_ref, x_ref, w1_ref, b1_ref, w2_ref, b2_ref,
                      w3_ref, b3_ref, o_ref):
    """Fused 3-layer MLP on one batch-lane tile, feature-major layout.

    Per-tile shapes:
      al_ref : (1, 1)        f32 act_limit scalar in SMEM
      x_ref  : [obs_p, TB]   f32 observations (features on sublanes, batch on lanes)
      wK_ref : [out_p, in_p] compute dtype (f32 or bf16) = W_k^T, VMEM-resident
      bK_ref : [out_p, 1]    f32 bias column, broadcast along lanes
      o_ref  : [act_p, TB]   f32 output tile (lane-dense unmasked stores)

    Matmuls run in the weights' dtype with f32 accumulation; bias-add / ReLU /
    tanh / act-limit scaling run in f32 on the VPU/EUP.
    """
    mm_dtype = w1_ref.dtype
    act_limit = al_ref[0, 0]

    x = x_ref[...].astype(mm_dtype)                              # cast in-kernel (free)

    h = jnp.dot(w1_ref[...], x, preferred_element_type=jnp.float32) + b1_ref[...]
    h = jnp.maximum(h, 0.0)                                      # ReLU, f32

    h = jnp.dot(w2_ref[...], h.astype(mm_dtype),
                preferred_element_type=jnp.float32) + b2_ref[...]
    h = jnp.maximum(h, 0.0)                                      # ReLU, f32

    h = jnp.dot(w3_ref[...], h.astype(mm_dtype),
                preferred_element_type=jnp.float32) + b3_ref[...]

    o_ref[...] = (act_limit * jnp.tanh(h)).astype(o_ref.dtype)


def prepare_params(params, *, compute_dtype=jnp.float32):
    """Pad / transpose / cast the MLP parameters ONCE (hoisted out of the call path).

    Layout is feature-major: weights are stored as W^T with output features on
    the sublane axis (zero-padded to multiples of 16) so the kernel computes
    W^T @ X^T with the batch on the lane axis.  Zero padding is exact: padded
    weight rows/cols and biases are 0, so padded features stay 0 through the
    ReLU layers and padded action rows are sliced off in the wrapper.

    compute_dtype: jnp.float32 (matches PyTorch numerics) or jnp.bfloat16
    (halves weight/activation DMA + VMEM footprint and runs at native MXU rate
    on v5e, v6e and v7x; accumulation stays f32, bias/ReLU/tanh stay f32).
    """
    w1, b1 = params["w1"], params["b1"]
    w2, b2 = params["w2"], params["b2"]
    w3, b3 = params["w3"], params["b3"]

    obs_dim, h1 = w1.shape
    h2 = w2.shape[1]
    act_dim = w3.shape[1]

    obs_p = _round_up(obs_dim, _FSUB)
    h1_p = _round_up(h1, _FSUB)
    h2_p = _round_up(h2, _FSUB)
    act_p = _round_up(act_dim, _FSUB)

    def pad2(a, rows, cols):
        return jnp.pad(a, ((0, rows - a.shape[0]), (0, cols - a.shape[1])))

    return {
        "w1t": pad2(w1, obs_p, h1_p).T.astype(compute_dtype),    # [h1_p, obs_p]
        "w2t": pad2(w2, h1_p, h2_p).T.astype(compute_dtype),     # [h2_p, h1_p]
        "w3t": pad2(w3, h2_p, act_p).T.astype(compute_dtype),    # [act_p, h2_p]
        "b1t": pad2(b1, 1, h1_p).reshape(h1_p, 1).astype(jnp.float32),
        "b2t": pad2(b2, 1, h2_p).reshape(h2_p, 1).astype(jnp.float32),
        "b3t": pad2(b3, 1, act_p).reshape(act_p, 1).astype(jnp.float32),
        "obs_dim": obs_dim,
        "act_dim": act_dim,
    }


def mlp_actor_forward(obs, prepared, act_limit, *, batch_tile=512):
    """MLPActor forward: act_limit * tanh(MLP(obs)).

    obs:       [B, obs_dim] float32
    prepared:  output of prepare_params() (padded/transposed/casted once)
    act_limit: python float or scalar; delivered to the kernel via SMEM so
               changing it does not retrace/recompile.
    """
    obs_dim = prepared["obs_dim"]
    act_dim = prepared["act_dim"]
    w1t, b1t = prepared["w1t"], prepared["b1t"]
    w2t, b2t = prepared["w2t"], prepared["b2t"]
    w3t, b3t = prepared["w3t"], prepared["b3t"]

    B = obs.shape[0]
    assert obs.shape[1] == obs_dim
    h1_p, obs_p = w1t.shape
    h2_p = w2t.shape[0]
    act_p = w3t.shape[0]

    # Batch on the 128-wide lane axis.  Big tiles amortize per-step overhead;
    # for padded batches >= 512 keep >= 2 tiles (each >= 256 lanes) so the
    # "parallel" axis shards across v7x's two TensorCores.
    bp_min = _round_up(B, _LANE)
    if bp_min >= 4 * _LANE:
        tb_cap = max(2 * _LANE, _round_up(bp_min // 2, _LANE))
    else:
        tb_cap = bp_min
    TB = min(_round_up(batch_tile, _LANE), tb_cap)
    Bp = _round_up(B, TB)
    num_tiles = Bp // TB

    # Per-call prep is only layout plumbing on obs (transpose + zero-pad);
    # no per-call weight pads/casts, no cast of obs (done in-kernel).
    x_t = jnp.pad(obs.T, ((0, obs_p - obs_dim), (0, Bp - B)))    # [obs_p, Bp] f32
    al = jnp.full((1, 1), act_limit, dtype=jnp.float32)

    flops = 2 * Bp * (obs_p * h1_p + h1_p * h2_p + h2_p * act_p)
    bytes_accessed = (x_t.size * x_t.dtype.itemsize
                      + sum(a.size * a.dtype.itemsize
                            for a in (w1t, b1t, w2t, b2t, w3t, b3t))
                      + Bp * act_p * 4)

    def resident(a):   # weights / biases: same (full) block every grid step
        return pl.BlockSpec(a.shape, lambda i: (0, 0))

    out_padded = pl.pallas_call(
        _mlp_actor_kernel,
        out_shape=jax.ShapeDtypeStruct((act_p, Bp), jnp.float32),
        grid=(num_tiles,),
        in_specs=[
            pl.BlockSpec(memory_space=pltpu.MemorySpace.SMEM),   # act_limit scalar
            pl.BlockSpec((obs_p, TB), lambda i: (0, i)),         # obs tile
            resident(w1t), resident(b1t),
            resident(w2t), resident(b2t),
            resident(w3t), resident(b3t),
        ],
        out_specs=pl.BlockSpec((act_p, TB), lambda i: (0, i)),
        compiler_params=pltpu.CompilerParams(
            dimension_semantics=("parallel",)),
        cost_estimate=pl.CostEstimate(
            flops=flops,
            transcendentals=Bp * act_p,     # tanh on the EUP
            bytes_accessed=bytes_accessed),
    )(al, x_t, w1t, b1t, w2t, b2t, w3t, b3t)

    # [act_p, Bp] -> [B, act_dim]
    return out_padded[:act_dim, :B].T


def init_params(key, sizes):
    """Deterministic init matching PyTorch nn.Linear default:
    U(-1/sqrt(fan_in), 1/sqrt(fan_in)) for both weight and bias."""
    params = {}
    keys = jax.random.split(key, 2 * (len(sizes) - 1))
    for j in range(len(sizes) - 1):
        fan_in, fan_out = sizes[j], sizes[j + 1]
        bound = 1.0 / (fan_in ** 0.5)
        w = jax.random.uniform(keys[2 * j], (fan_in, fan_out),
                               minval=-bound, maxval=bound, dtype=jnp.float32)
        b = jax.random.uniform(keys[2 * j + 1], (1, fan_out),
                               minval=-bound, maxval=bound, dtype=jnp.float32)
        params[f"w{j + 1}"] = w
        params[f"b{j + 1}"] = b
    return params


def reference_forward(obs, params, act_limit):
    h = jnp.maximum(obs @ params["w1"] + params["b1"], 0.0)
    h = jnp.maximum(h @ params["w2"] + params["b2"], 0.0)
    h = h @ params["w3"] + params["b3"]
    return act_limit * jnp.tanh(h)


if __name__ == "__main__":
    # Shapes consistent with MLPActor(observation_size, action_size,
    # action_range, hidden_sizes, activation=nn.ReLU):
    observation_size = 16
    action_size = 4
    hidden_sizes = (32, 32)
    action_range = (-2.0, 2.0)
    act_limit = action_range[1]

    key = jax.random.PRNGKey(0)
    k_obs, k_obs_big, k_params = jax.random.split(key, 3)

    sizes = [observation_size] + list(hidden_sizes) + [action_size]
    params = init_params(k_params, sizes)

    # Parameter padding/transpose/cast hoisted out of the per-call path.
    prepared_f32 = prepare_params(params, compute_dtype=jnp.float32)
    prepared_bf16 = prepare_params(params, compute_dtype=jnp.bfloat16)

    # 1) Small batch (original spec shape), exact f32 path.
    batch = 2
    obs = jax.random.normal(k_obs, (batch, observation_size), dtype=jnp.float32)
    out = jax.block_until_ready(mlp_actor_forward(obs, prepared_f32, act_limit))
    ref = reference_forward(obs, params, act_limit)
    assert out.shape == (batch, action_size)
    assert jnp.allclose(out, ref, atol=1e-5, rtol=1e-5)

    # 2) Larger batch exercising the 2-tile "parallel" grid (v7x megacore split).
    batch_big = 512
    obs_big = jax.random.normal(k_obs_big, (batch_big, observation_size),
                                dtype=jnp.float32)
    out_big = jax.block_until_ready(mlp_actor_forward(obs_big, prepared_f32, act_limit))
    ref_big = reference_forward(obs_big, params, act_limit)
    assert out_big.shape == (batch_big, action_size)
    assert jnp.allclose(out_big, ref_big, atol=1e-5, rtol=1e-5)

    # 3) bf16 matmul operands with f32 accumulation (native MXU rate on v5e/v6e/v7x).
    out_bf16 = jax.block_until_ready(
        mlp_actor_forward(obs_big, prepared_bf16, act_limit))
    assert out_bf16.shape == (batch_big, action_size)
    assert jnp.allclose(out_bf16, ref_big, atol=0.2, rtol=0.05)

    print("KERNEL_OK")
</pallas_src>

<mosaic_0001>
module attributes {stable_mosaic.version = 11 : i64} {
  func.func @_mlp_actor_kernel(%arg0: i32, %arg1: memref<1x1xf32, #tpu.memory_space<smem>>, %arg2: memref<16x128xf32, #tpu.memory_space<vmem>>, %arg3: memref<32x16xf32, #tpu.memory_space<vmem>>, %arg4: memref<32x1xf32, #tpu.memory_space<vmem>>, %arg5: memref<32x32xf32, #tpu.memory_space<vmem>>, %arg6: memref<32x1xf32, #tpu.memory_space<vmem>>, %arg7: memref<16x32xf32, #tpu.memory_space<vmem>>, %arg8: memref<16x1xf32, #tpu.memory_space<vmem>>, %arg9: memref<16x128xf32, #tpu.memory_space<vmem>>) attributes {dimension_semantics = [#tpu.dimension_semantics<parallel>], iteration_bounds = array<i64: 1>, scalar_prefetch = 0 : i64, scratch_operands = 0 : i64, tpu.core_type = #tpu.core_type<tc>, window_params = [{transform_indices = @transform_0, window_bounds = array<i64: 1, 1>}, {transform_indices = @transform_1, window_bounds = array<i64: 16, 128>}, {pipeline_mode = #tpu.pipeline_mode<synchronous>, transform_indices = @transform_2, window_bounds = array<i64: 32, 16>}, {pipeline_mode = #tpu.pipeline_mode<synchronous>, transform_indices = @transform_3, window_bounds = array<i64: 32, 1>}, {pipeline_mode = #tpu.pipeline_mode<synchronous>, transform_indices = @transform_4, window_bounds = array<i64: 32, 32>}, {pipeline_mode = #tpu.pipeline_mode<synchronous>, transform_indices = @transform_5, window_bounds = array<i64: 32, 1>}, {pipeline_mode = #tpu.pipeline_mode<synchronous>, transform_indices = @transform_6, window_bounds = array<i64: 16, 32>}, {pipeline_mode = #tpu.pipeline_mode<synchronous>, transform_indices = @transform_7, window_bounds = array<i64: 16, 1>}, {transform_indices = @transform_8, window_bounds = array<i64: 16, 128>}]} {
    %c0 = arith.constant 0 : index
    %c0_0 = arith.constant 0 : index
    %0 = memref.load %arg1[%c0, %c0_0] : memref<1x1xf32, #tpu.memory_space<smem>>
    %c0_1 = arith.constant 0 : index
    %c0_2 = arith.constant 0 : index
    %1 = vector.load %arg2[%c0_1, %c0_2] : memref<16x128xf32, #tpu.memory_space<vmem>>, vector<16x128xf32>
    %c0_3 = arith.constant 0 : index
    %c0_4 = arith.constant 0 : index
    %2 = vector.load %arg3[%c0_3, %c0_4] : memref<32x16xf32, #tpu.memory_space<vmem>>, vector<32x16xf32>
    %cst = arith.constant dense<0.000000e+00> : vector<32x128xf32>
    %3 = tpu.matmul %2, %1, %cst {dimension_numbers = #tpu.dot_dimension_numbers<[1], [0], [0], [1], [0, 0, 1, 1], [], []>} : vector<32x16xf32>, vector<16x128xf32>, vector<32x128xf32> -> vector<32x128xf32>
    %c0_5 = arith.constant 0 : index
    %c0_6 = arith.constant 0 : index
    %4 = vector.load %arg4[%c0_5, %c0_6] : memref<32x1xf32, #tpu.memory_space<vmem>>, vector<32x1xf32>
    %5 = vector.broadcast %4 : vector<32x1xf32> to vector<32x128xf32>
    %6 = arith.addf %3, %5 : vector<32x128xf32>
    %cst_7 = arith.constant 0.000000e+00 : f32
    %7 = vector.broadcast %cst_7 : f32 to vector<32x128xf32>
    %8 = arith.maximumf %6, %7 : vector<32x128xf32>
    %c0_8 = arith.constant 0 : index
    %c0_9 = arith.constant 0 : index
    %9 = vector.load %arg5[%c0_8, %c0_9] : memref<32x32xf32, #tpu.memory_space<vmem>>, vector<32x32xf32>
    %cst_10 = arith.constant dense<0.000000e+00> : vector<32x128xf32>
    %10 = tpu.matmul %9, %8, %cst_10 {dimension_numbers = #tpu.dot_dimension_numbers<[1], [0], [0], [1], [0, 0, 1, 1], [], []>} : vector<32x32xf32>, vector<32x128xf32>, vector<32x128xf32> -> vector<32x128xf32>
    %c0_11 = arith.constant 0 : index
    %c0_12 = arith.constant 0 : index
    %11 = vector.load %arg6[%c0_11, %c0_12] : memref<32x1xf32, #tpu.memory_space<vmem>>, vector<32x1xf32>
    %12 = vector.broadcast %11 : vector<32x1xf32> to vector<32x128xf32>
    %13 = arith.addf %10, %12 : vector<32x128xf32>
    %cst_13 = arith.constant 0.000000e+00 : f32
    %14 = vector.broadcast %cst_13 : f32 to vector<32x128xf32>
    %15 = arith.maximumf %13, %14 : vector<32x128xf32>
    %c0_14 = arith.constant 0 : index
    %c0_15 = arith.constant 0 : index
    %16 = vector.load %arg7[%c0_14, %c0_15] : memref<16x32xf32, #tpu.memory_space<vmem>>, vector<16x32xf32>
    %cst_16 = arith.constant dense<0.000000e+00> : vector<16x128xf32>
    %17 = tpu.matmul %16, %15, %cst_16 {dimension_numbers = #tpu.dot_dimension_numbers<[1], [0], [0], [1], [0, 0, 1, 1], [], []>} : vector<16x32xf32>, vector<32x128xf32>, vector<16x128xf32> -> vector<16x128xf32>
    %c0_17 = arith.constant 0 : index
    %c0_18 = arith.constant 0 : index
    %18 = vector.load %arg8[%c0_17, %c0_18] : memref<16x1xf32, #tpu.memory_space<vmem>>, vector<16x1xf32>
    %19 = vector.broadcast %18 : vector<16x1xf32> to vector<16x128xf32>
    %20 = arith.addf %17, %19 : vector<16x128xf32>
    %21 = math.tanh %20 : vector<16x128xf32>
    %22 = vector.broadcast %0 : f32 to vector<16x128xf32>
    %23 = arith.mulf %22, %21 : vector<16x128xf32>
    %c0_19 = arith.constant 0 : index
    %c0_20 = arith.constant 0 : index
    %24 = vector.load %arg9[%c0_19, %c0_20] : memref<16x128xf32, #tpu.memory_space<vmem>>, vector<16x128xf32>
    tpu.vector_store %arg9[%c0_19, %c0_20], %23 {strides = array<i32>} : memref<16x128xf32, #tpu.memory_space<vmem>>, vector<16x128xf32>,
    return
  }
  func.func @transform_0(%arg0: i32) -> (i32, i32) {
    %c0_i32 = arith.constant 0 : i32
    %c0_i32_0 = arith.constant 0 : i32
    %c0_i32_1 = arith.constant 0 : i32
    return %c0_i32, %c0_i32_0 : i32, i32
  }
  func.func @transform_1(%arg0: i32) -> (i32, i32) {
    %c0_i32 = arith.constant 0 : i32
    %c0_i32_0 = arith.constant 0 : i32
    return %c0_i32, %arg0 : i32, i32
  }
  func.func @transform_2(%arg0: i32) -> (i32, i32) {
    %c0_i32 = arith.constant 0 : i32
    %c0_i32_0 = arith.constant 0 : i32
    %c0_i32_1 = arith.constant 0 : i32
    return %c0_i32, %c0_i32_0 : i32, i32
  }
  func.func @transform_3(%arg0: i32) -> (i32, i32) {
    %c0_i32 = arith.constant 0 : i32
    %c0_i32_0 = arith.constant 0 : i32
    %c0_i32_1 = arith.constant 0 : i32
    return %c0_i32, %c0_i32_0 : i32, i32
  }
  func.func @transform_4(%arg0: i32) -> (i32, i32) {
    %c0_i32 = arith.constant 0 : i32
    %c0_i32_0 = arith.constant 0 : i32
    %c0_i32_1 = arith.constant 0 : i32
    return %c0_i32, %c0_i32_0 : i32, i32
  }
  func.func @transform_5(%arg0: i32) -> (i32, i32) {
    %c0_i32 = arith.constant 0 : i32
    %c0_i32_0 = arith.constant 0 : i32
    %c0_i32_1 = arith.constant 0 : i32
    return %c0_i32, %c0_i32_0 : i32, i32
  }
  func.func @transform_6(%arg0: i32) -> (i32, i32) {
    %c0_i32 = arith.constant 0 : i32
    %c0_i32_0 = arith.constant 0 : i32
    %c0_i32_1 = arith.constant 0 : i32
    return %c0_i32, %c0_i32_0 : i32, i32
  }
  func.func @transform_7(%arg0: i32) -> (i32, i32) {
    %c0_i32 = arith.constant 0 : i32
    %c0_i32_0 = arith.constant 0 : i32
    %c0_i32_1 = arith.constant 0 : i32
    return %c0_i32, %c0_i32_0 : i32, i32
  }
  func.func @transform_8(%arg0: i32) -> (i32, i32) {
    %c0_i32 = arith.constant 0 : i32
    %c0_i32_0 = arith.constant 0 : i32
    return %c0_i32, %arg0 : i32, i32
  }
}

</mosaic_0001>

<bundles_post_ra>
// kernel: tpu_custom_call.1
= control target key start
LH: loop header
LB: loop body
LE: loop exit
PB: predicated region body
PF: predicated region fallthrough
CT: control target
= control target key end

     0   :  { %vm62_vm0 = vcmask 130048   ;;  %v531_v4 = vmov 0   ;;  %s671_s0 = inlined_call_operand.<no memory space> [shape: f32[1,1], index: 0, kind: input, shape index: {}]   ;;  %s672_s1 = inlined_call_operand.vmem [shape: f32[16,128], index: 1, kind: input, shape index: {}]   ;;  %s673_s2 = inlined_call_operand.vmem [shape: f32[32,16], index: 2, kind: input, shape index: {}]   ;;  %s674_s3 = inlined_call_operand.vmem [shape: f32[32,1], index: 3, kind: input, shape index: {}]   ;;  %s675_s4 = inlined_call_operand.vmem [shape: f32[32,32], index: 4, kind: input, shape index: {}]   ;;  %s676_s5 = inlined_call_operand.vmem [shape: f32[32,1], index: 5, kind: input, shape index: {}]   ;;  %s677_s6 = inlined_call_operand.vmem [shape: f32[16,32], index: 6, kind: input, shape index: {}]   ;;  %s678_s7 = inlined_call_operand.vmem [shape: f32[16,1], index: 7, kind: input, shape index: {}]   ;;  %s679_s8 = inlined_call_operand.hbm [shape: f32[16,128], index: 8, kind: output, shape index: {}]  }
   0x1   :  { %v32_v0 = vld [vmem:[%s672_s1] sm:$0xff]  ;;  %v33_v1 = vld [vmem:[%s672_s1 + $0x8] sm:$0xff]  ;;  %501 = vset.pattern.permute.xlu0 %v531_v4  ;;  %502 = vset.pattern.permute.xlu1 %v531_v4  ;;  %v40_v6 = vld [vmem:[%s674_s3 + $0x10] sm:$0xff] }
   0x2   :  { %v34_v2 = vld [vmem:[%s673_s2] sm:$0xff]  ;;  %v477_v3 = vpack.c.bf16 %v33_v1, %v32_v0  ;;  %v35_v7 = vld [vmem:[%s673_s2 + $0x8] sm:$0xff]  ;;  %54 = vperm.xlu1 %502, %v40_v6   ;;  %v36_v9 = vld [vmem:[%s673_s2 + $0x10] sm:$0xff] }
   0x3   :  { %446 = vmatprep.mubr.msk.f32.mxu0 %vm62_vm0, %v34_v2  ;;  %v38_v5 = vld [vmem:[%s674_s3] sm:$0xff]  ;;  %v39_v8 = vld [vmem:[%s674_s3 + $0x8] sm:$0xff]  ;;  %v41_v10 = vld [vmem:[%s674_s3 + $0x18] sm:$0xff] }
   0x4   :  { %478 = vmatprep.subr.bf16.mxu0 %v477_v3  ;;  %44 = vperm.xlu0 %501, %v38_v5  }
   0x5   :  { %480 = vmatpush3.bf16.msra.mxu0 %v477_v3 }
   0x6   :  { %14 = vsyncpa [#allocation4], 0  ;;  %v37_v11 = vld [vmem:[%s673_s2 + $0x18] sm:$0xff]  ;;  %59 = vperm.xlu1 %502, %v41_v10   ;;  %v168_v12 = vld [vmem:[%s676_s5] sm:$0xff]  ;;  %vm192_vm1 = vcmask 261120   ;;  %v391_v2 = vstv %s671_s0  ;;  %s532_s22 = smov [#allocation3]  }
   0x7   :  { %v169_v13 = vld [vmem:[%s676_s5 + $0x8] sm:$0xff]  ;;  %v170_v14 = vld [vmem:[%s676_s5 + $0x10] sm:$0xff]  ;;  %v171_v15 = vld [vmem:[%s676_s5 + $0x18] sm:$0xff]  ;;  %s401_s23 = sshll.u32 %s532_s22, 4  ;;  %s402_s23 = int_to_ptr.vmem [resolvable:$true] %s401_s23 }
   0x8   :  { %447 = vmatmul.mubr.msk.f32.vlgmr.msra.gmra.mrb[0].mxu0 %vm62_vm0, %v35_v7  ;;  %49 = vperm.xlu0 %501, %v39_v8   ;;  %v296_v16 = vld [vmem:[%s678_s7] sm:$0xff]  ;;  %v297_v17 = vld [vmem:[%s678_s7 + $0x8] sm:$0xff]  ;;  %v166_v38 = vld [vmem:[%s675_s4 + $0x10] sm:$0xff]  ;;  %p512_p1 = scmp.lt.s32.totalorder %s402_s23, %s402_s23 }
   0x9   :  { %449 = vmatprep.mubr.msk.f32.mxu0 %vm62_vm0, %v36_v9  ;;  %v164_v18 = vld [vmem:[%s675_s4] sm:$0xff]  ;;  %v165_v37 = vld [vmem:[%s675_s4 + $0x8] sm:$0xff]  ;;  %v167_v39 = vld [vmem:[%s675_s4 + $0x18] sm:$0xff] }
   0xa   :  { %179 = vperm.xlu1 %502, %v169_v13   ;;  %460 = vmatprep.mubr.msk.f32.mxu1 %vm192_vm1, %v164_v18  ;;  %v294_v40 = vld [vmem:[%s677_s6] sm:$0xff]  ;;  %v295_v59 = vld [vmem:[%s677_s6 + $0x8] sm:$0xff]  ;;  %s507_s6 = scalar_lea.vmem %s402_s23, 256 }
   0xb   :  { %p508_p0 = scmp.ne.s32.totalorder %s402_s23, %s507_s6  ;;  %p513_p2 = scmp.lt.s32.totalorder %s507_s6, %s507_s6 }
   0xc   :  { %450 = vmatmul.mubr.msk.f32.gmra.mrb[2].mxu0 %vm62_vm0, %v37_v11  ;;  %174 = vperm.xlu0 %501, %v168_v12  }
   0xd   :  { %474 = vmatprep.mubr.msk.f32.mxu0 %vm192_vm1, %v294_v40  ;;  %p514_p3 = por %p513_p2, %p512_p1 }
   0xe   :  { %189 = vperm.xlu1 %502, %v171_v15  }
   0xf   :  { %p515_p4 = pnand %p514_p3, %p508_p0 }
  0x10   :  { %184 = vperm.xlu0 %501, %v170_v14  }
  0x12   :  { %305 = vperm.xlu1 %502, %v297_v17  }
  0x14   :  { %300 = vperm.xlu0 %501, %v296_v16  }
  0x81   :  { %v55_v20 = vpop.permute.xlu1 %54 }
  0x83   :  { %v45_v19 = vpop.permute.xlu0 %44 }
  0x85   :  { %v60_v27 = vpop.permute.xlu1 %59 }
  0x87   :  { %v50_v21 = vpop.permute.xlu0 %49 }
  0x89   :  { %v180_v41 = vpop.permute.xlu1 %179 }
  0x8b   :  { %v175_v42 = vpop.permute.xlu0 %174 }
  0x8d   :  { %v190_v48 = vpop.permute.xlu1 %189 }
  0x8f   :  { %v185_v51 = vpop.permute.xlu0 %184 }
  0x91   :  { %v306_v60 = vpop.permute.xlu1 %305 }
  0x93   :  { %v301_v62 = vpop.permute.xlu0 %300 }
  0xdb   :  { %v448_v22 = vpop.f32.mrb[0].mxu0 }
  0xdc   :  { %v147_v23 = vadd.f32 %v448_v22, %v50_v21  ;;  %v141_v24 = vpop.f32.mrb[1].mxu0 }
  0xdd   :  { %v142_v25 = vadd.f32 %v141_v24, %v45_v19 }
  0xde   :  { %v161_v26 = vmax.f32 %v147_v23, 0.0 }
  0xdf   :  { %v160_v28 = vmax.f32 %v142_v25, 0.0  ;;  %v451_v29 = vpop.f32.mrb[2].mxu0 }
  0xe0   :  { %v157_v30 = vadd.f32 %v451_v29, %v60_v27  ;;  %v151_v31 = vpop.f32.mrb[3].mxu0 }
  0xe1   :  { %v152_v32 = vadd.f32 %v151_v31, %v55_v20  ;;  %v481_v33 = vpack.c.bf16 %v161_v26, %v160_v28 }
  0xe2   :  { %v163_v34 = vmax.f32 %v157_v30, 0.0 }
  0xe3   :  { %v162_v35 = vmax.f32 %v152_v32, 0.0  ;;  %482 = vmatprep.subr.bf16.mxu1 %v481_v33 }
  0xe4   :  { %484 = vmatpush3.bf16.msra.mxu1 %v481_v33 }
  0xe5   :  { %v485_v36 = vpack.c.bf16 %v163_v34, %v162_v35 }
  0xe7   :  { %486 = vmatprep.subr.bf16.mxu1 %v485_v36 }
  0xe8   :  { %488 = vmatpush3.bf16.msra.mxu1 %v485_v36 }
  0xeb   :  { %461 = vmatmul.mubr.msk.f32.vlgmr.msra.gmra.mrb[0].mxu1 %vm192_vm1, %v165_v37 }
  0xec   :  { %463 = vmatprep.mubr.msk.f32.mxu1 %vm192_vm1, %v166_v38 }
  0xef   :  { %464 = vmatmul.mubr.msk.f32.gmra.mrb[2].mxu1 %vm192_vm1, %v167_v39 }
 0x1be   :  { %v462_v43 = vpop.f32.mrb[0].mxu1 }
 0x1bf   :  { %v277_v44 = vadd.f32 %v462_v43, %v180_v41  ;;  %v271_v45 = vpop.f32.mrb[1].mxu1 }
 0x1c0   :  { %v272_v46 = vadd.f32 %v271_v45, %v175_v42 }
 0x1c1   :  { %v291_v47 = vmax.f32 %v277_v44, 0.0 }
 0x1c2   :  { %v290_v49 = vmax.f32 %v272_v46, 0.0  ;;  %v465_v50 = vpop.f32.mrb[2].mxu1 }
 0x1c3   :  { %v287_v52 = vadd.f32 %v465_v50, %v190_v48  ;;  %v281_v53 = vpop.f32.mrb[3].mxu1 }
 0x1c4   :  { %v489_v54 = vpack.c.bf16 %v291_v47, %v290_v49  ;;  %v282_v55 = vadd.f32 %v281_v53, %v185_v51 }
 0x1c5   :  { %v293_v56 = vmax.f32 %v287_v52, 0.0 }
 0x1c6   :  { %v292_v57 = vmax.f32 %v282_v55, 0.0  ;;  %490 = vmatprep.subr.bf16.mxu0 %v489_v54 }
 0x1c7   :  { %492 = vmatpush3.bf16.msra.mxu0 %v489_v54 }
 0x1c8   :  { %v493_v58 = vpack.c.bf16 %v293_v56, %v292_v57 }
 0x1ca   :  { %494 = vmatprep.subr.bf16.mxu0 %v493_v58 }
 0x1cb   :  { %496 = vmatpush3.bf16.msra.mxu0 %v493_v58 }
 0x1ce   :  { %475 = vmatmul.mubr.msk.f32.vlgmr.msra.gmra.mrb[4].mxu0 %vm192_vm1, %v295_v59 }
 0x2a1   :  { %v476_v61 = vpop.f32.mrb[4].mxu0 }
 0x2a2   :  { %v386_v63 = vadd.f32 %v476_v61, %v306_v60  ;;  %v380_v0 = vpop.f32.mrb[5].mxu0 }
 0x2a3   :  { %v381_v1 = vadd.f32 %v380_v0, %v301_v62 }
 0x2a4   :  { %503 = vtanh.f32 %v386_v63 }
 0x2a5   :  { %505 = vtanh.f32 %v381_v1 }
 0x2ae   :  { %v504_v3 = vpop.eup %503 }
 0x2af   :  { %v506_v4 = vpop.eup %505  ;;  %v393_v5 = vmul.f32 %v504_v3, %v391_v2 }
 0x2b0   :  { %v392_v6 = vmul.f32 %v506_v4, %v391_v2 }
 0x2b1   :  { %395 = vst [vmem:[#allocation3 + $0x8] sm:$0xff] %v393_v5 }
 0x2b2   :  { %394 = vst [vmem:[#allocation3] sm:$0xff] %v392_v6 }
 0x2b3   :  { %518 = shalt.err (!%p515_p4)
}
 0x2b4   :  { %s519_s0 = scalar_lea.hbm %s679_s8, 256 }
 0x2b5   :  { %p520_p5 = scmp.ne.s32.totalorder %s679_s8, %s519_s0  ;;  %p523_p6 = scmp.lt.u32.totalorder %s519_s0, %s679_s8 }
 0x2b7   :  { %p525_p7 = pnand %p523_p6, %p520_p5 }
 0x2b9   :  { %528 = shalt.err (!%p525_p7)
}
 0x2ba   :  { %s533_s29 = smov 128   ;;  %s534_s30 = smov 8  }
 0x2bb   :  { %407 = dma.vmem_to_hbm [thread:$0]  %s402_s23, 256, %s679_s8, [#allocation4], %s533_s29, %s533_s29, %s534_s30  }
 0x2bc   :  { %529 = dma.done.wait [#allocation4], 256  }
 0x2bd   :  { %530 = vsyncadd [#allocation4], 4294967040 }
 0x2be   :  { %411 = vsyncpa [#allocation4], 1 }

</bundles_post_ra>
